<compile_context>
chip_gen: v6e
topology: v6e:2x2x1
jax: 0.10.0
libtpu: 0.0.40
codegen_flags: <defaults>
</compile_context>

<pallas_src>
import jax
import jax.numpy as jnp
from jax.experimental import pallas as pl
from jax.experimental.pallas import tpu as pltpu

LANE = 128
SUBLANE = 8
NEG_BIG = -1e30


def _round_up(n, m):
    return ((n + m - 1) // m) * m


def _pad_dim(n):
    # Lane-dense for small dims; full 2x256^2 MXU passes once a dim exceeds
    # one lane group (relevant on v6e/v7x if d_hid / n_classes grow).
    return _round_up(n, 256) if n > LANE else _round_up(n, LANE)


def deephit_kernel(x_ref, w1_ref, b1_ref, w2_ref, b2_ref, wh_ref, bh_ref,
                   tri_ref, feat_ref, logits_ref, pmf_ref, cdf_ref):
    # ---- MLP encoder: Linear -> ReLU -> Linear -> ReLU (bf16 MXU, f32 acc) ----
    h = jnp.dot(x_ref[...], w1_ref[...],
                preferred_element_type=jnp.float32) + b1_ref[...]
    h = jnp.maximum(h, 0.0)
    feat = jnp.dot(h.astype(jnp.bfloat16), w2_ref[...],
                   preferred_element_type=jnp.float32) + b2_ref[...]
    feat = jnp.maximum(feat, 0.0)
    feat_ref[...] = feat.astype(feat_ref.dtype)          # bf16 store

    # ---- head Linear ----
    logits = jnp.dot(feat.astype(jnp.bfloat16), wh_ref[...],
                     preferred_element_type=jnp.float32) + bh_ref[...]
    logits_ref[...] = logits.astype(logits_ref.dtype)    # bf16 store

    # ---- softmax over classes (f32; padded classes carry -1e30 bias -> 0) ----
    m = jnp.max(logits, axis=1, keepdims=True)
    e = jnp.exp(logits - m)
    denom = jnp.sum(e, axis=1, keepdims=True)
    pmf = e * pl.reciprocal(denom, approx=False)          # exact: kernel is HBM-bound
    pmf_ref[...] = pmf

    # ---- cumsum over classes via upper-triangular matmul (bf16 ops, f32 acc) ----
    cdf = jnp.dot(pmf.astype(jnp.bfloat16), tri_ref[...],
                  preferred_element_type=jnp.float32)
    cdf_ref[...] = jnp.clip(cdf, 0.0, 1.0)


def init_params(key, n_features, d_hid, n_classes):
    """Unpadded f32 params, PyTorch nn.Linear-style init, weights as (in, out)."""
    k1, k2, k3, k4, k5, k6 = jax.random.split(key, 6)
    s1 = 1.0 / jnp.sqrt(n_features)
    s2 = 1.0 / jnp.sqrt(d_hid)
    return {
        "w1": jax.random.uniform(k1, (n_features, d_hid), jnp.float32, -s1, s1),
        "b1": jax.random.uniform(k2, (1, d_hid), jnp.float32, -s1, s1),
        "w2": jax.random.uniform(k3, (d_hid, d_hid), jnp.float32, -s2, s2),
        "b2": jax.random.uniform(k4, (1, d_hid), jnp.float32, -s2, s2),
        "wh": jax.random.uniform(k5, (d_hid, n_classes), jnp.float32, -s2, s2),
        "bh": jax.random.uniform(k6, (1, n_classes), jnp.float32, -s2, s2),
    }


def prepare_params(params, n_features, d_hid, n_classes):
    """Pad hidden/class dims (128, or 256 once >128), cast matmul operands to bf16.

    The feature (contraction) dim of w1 is intentionally NOT padded."""
    Hp = _pad_dim(d_hid)
    Cp = _pad_dim(n_classes)

    w1 = jnp.zeros((n_features, Hp), jnp.bfloat16).at[:, :d_hid].set(
        params["w1"].astype(jnp.bfloat16))
    b1 = jnp.zeros((1, Hp), jnp.float32).at[:, :d_hid].set(params["b1"])
    w2 = jnp.zeros((Hp, Hp), jnp.bfloat16).at[:d_hid, :d_hid].set(
        params["w2"].astype(jnp.bfloat16))
    b2 = jnp.zeros((1, Hp), jnp.float32).at[:, :d_hid].set(params["b2"])
    wh = jnp.zeros((Hp, Cp), jnp.bfloat16).at[:d_hid, :n_classes].set(
        params["wh"].astype(jnp.bfloat16))
    # Padded classes get a hugely negative bias so softmax/argmax/cdf ignore them.
    bh = jnp.full((1, Cp), NEG_BIG, jnp.float32).at[:, :n_classes].set(params["bh"])

    # Upper-triangular cumsum matrix (exact 0/1 values -> bf16 lossless),
    # built once and kept VMEM-resident.
    row = jnp.arange(Cp)[:, None]
    col = jnp.arange(Cp)[None, :]
    tri = (row <= col).astype(jnp.bfloat16)

    return {"w1": w1, "b1": b1, "w2": w2, "b2": b2, "wh": wh, "bh": bh,
            "tri": tri}


def _choose_batch_tiling(B, tile_b):
    """Tile size / padded batch.

    Keeps tiles <= tile_b, forces >=2 grid steps once the batch is non-trivial
    (so the "parallel" grid axis shards across both v7x TensorCores), and
    bounds batch-padding waste to < SUBLANE rows per tile."""
    n_steps = pl.cdiv(B, tile_b)
    if B >= 4 * SUBLANE:
        n_steps = max(n_steps, 2)
    TB = _round_up(pl.cdiv(B, n_steps), SUBLANE)
    Bp = _round_up(B, TB)
    return TB, Bp


def deephit_forward(x, pp, *, n_features, d_hid, n_classes,
                    tile_b=1024, vmem_limit_bytes=48 << 20):
    B = x.shape[0]
    F = pp["w1"].shape[0]
    Hp = pp["w1"].shape[1]
    Cp = pp["wh"].shape[1]
    assert F == n_features

    TB, Bp = _choose_batch_tiling(B, tile_b)

    # Pad only the batch dim; cast the matmul input to bf16 (halves x DMA).
    if Bp == B:
        xp = x.astype(jnp.bfloat16)
    else:
        xp = jnp.zeros((Bp, F), jnp.bfloat16).at[:B].set(x.astype(jnp.bfloat16))

    grid = (Bp // TB,)

    def row_spec(cols):
        return pl.BlockSpec((TB, cols), lambda i: (i, 0))

    def resident_spec(shape):
        return pl.BlockSpec(shape, lambda i: (0, 0))

    out_shapes = (
        jax.ShapeDtypeStruct((Bp, Hp), jnp.bfloat16),   # features  (bf16 store)
        jax.ShapeDtypeStruct((Bp, Cp), jnp.bfloat16),   # logits    (bf16 store)
        jax.ShapeDtypeStruct((Bp, Cp), jnp.float32),    # pmf
        jax.ShapeDtypeStruct((Bp, Cp), jnp.float32),    # cdf
    )

    fn = pl.pallas_call(
        deephit_kernel,
        out_shape=out_shapes,
        grid=grid,
        in_specs=[
            row_spec(F),
            resident_spec(pp["w1"].shape),
            resident_spec(pp["b1"].shape),
            resident_spec(pp["w2"].shape),
            resident_spec(pp["b2"].shape),
            resident_spec(pp["wh"].shape),
            resident_spec(pp["bh"].shape),
            resident_spec(pp["tri"].shape),
        ],
        out_specs=[row_spec(Hp), row_spec(Cp), row_spec(Cp), row_spec(Cp)],
        compiler_params=pltpu.CompilerParams(
            dimension_semantics=("parallel",),
            vmem_limit_bytes=vmem_limit_bytes,
        ),
    )
    feat, logits, pmf, cdf = fn(
        xp, pp["w1"], pp["b1"], pp["w2"], pp["b2"], pp["wh"], pp["bh"], pp["tri"])

    # Slice off batch / lane padding.
    feat = feat[:B, :d_hid]
    logits = logits[:B, :n_classes]
    pmf = pmf[:B, :n_classes]
    cdf = cdf[:B, :n_classes]

    # Derived quantities kept out of the kernel (cheap XLA ops; avoids
    # redundant HBM writes and 1-lane masked stores).
    surv = 1.0 - cdf
    fht = jnp.argmax(pmf, axis=1).astype(jnp.int32)
    prob_at_fht = jnp.take_along_axis(pmf, fht[:, None], axis=1)[:, 0]
    risk = -fht

    return {
        "features": feat, "logits": logits, "pmf": pmf, "risk": risk,
        "cdf": cdf, "surv": surv, "fht": fht, "prob_at_fht": prob_at_fht,
    }


def reference_forward(x, p):
    """Pure-JAX reference mirroring the bf16 matmul-operand casts."""
    bf = jnp.bfloat16
    h = jnp.maximum(jnp.dot(x.astype(bf), p["w1"].astype(bf),
                            preferred_element_type=jnp.float32) + p["b1"], 0.0)
    feat = jnp.maximum(jnp.dot(h.astype(bf), p["w2"].astype(bf),
                               preferred_element_type=jnp.float32) + p["b2"], 0.0)
    logits = jnp.dot(feat.astype(bf), p["wh"].astype(bf),
                     preferred_element_type=jnp.float32) + p["bh"]
    pmf = jax.nn.softmax(logits, axis=1)
    fht = jnp.argmax(pmf, axis=1).astype(jnp.int32)
    prob = jnp.take_along_axis(pmf, fht[:, None], axis=1)[:, 0]
    cdf = jnp.clip(jnp.cumsum(pmf, axis=1), 0.0, 1.0)
    return feat, logits, pmf, cdf, 1.0 - cdf, fht, prob, -fht


if __name__ == "__main__":
    B, n_features, d_hid, n_classes = 8, 16, 32, 8
    key = jax.random.PRNGKey(0)
    kx, kp = jax.random.split(key)
    x = jax.random.normal(kx, (B, n_features), jnp.float32)
    params = init_params(kp, n_features, d_hid, n_classes)
    padded = prepare_params(params, n_features, d_hid, n_classes)

    out = deephit_forward(x, padded, n_features=n_features, d_hid=d_hid,
                          n_classes=n_classes)
    jax.block_until_ready(out)

    # sanity check against a pure-JAX reference.
    #  * features/logits are stored bf16 by the kernel -> ~2^-9 relative error
    #  * cdf uses bf16 pmf operands on the MXU -> <=~2e-3 absolute error
    feat, logits, pmf, cdf, surv, fht, prob, risk = reference_forward(x, params)
    assert jnp.allclose(out["features"].astype(jnp.float32), feat, atol=2e-2)
    assert jnp.allclose(out["logits"].astype(jnp.float32), logits, atol=2e-2)
    assert jnp.allclose(out["pmf"], pmf, atol=2e-3)
    assert jnp.allclose(out["cdf"], cdf, atol=5e-3)
    assert jnp.allclose(out["surv"], surv, atol=5e-3)
    assert jnp.array_equal(out["fht"], fht)
    assert jnp.allclose(out["prob_at_fht"], prob, atol=2e-3)
    assert jnp.array_equal(out["risk"], risk)

    print("KERNEL_OK")
</pallas_src>

<mosaic_0001>
module attributes {stable_mosaic.version = 11 : i64} {
  func.func @deephit_kernel(%arg0: i32, %arg1: memref<8x16xbf16, #tpu.memory_space<vmem>>, %arg2: memref<16x128xbf16, #tpu.memory_space<vmem>>, %arg3: memref<1x128xf32, #tpu.memory_space<vmem>>, %arg4: memref<128x128xbf16, #tpu.memory_space<vmem>>, %arg5: memref<1x128xf32, #tpu.memory_space<vmem>>, %arg6: memref<128x128xbf16, #tpu.memory_space<vmem>>, %arg7: memref<1x128xf32, #tpu.memory_space<vmem>>, %arg8: memref<128x128xbf16, #tpu.memory_space<vmem>>, %arg9: memref<8x128xbf16, #tpu.memory_space<vmem>>, %arg10: memref<8x128xbf16, #tpu.memory_space<vmem>>, %arg11: memref<8x128xf32, #tpu.memory_space<vmem>>, %arg12: memref<8x128xf32, #tpu.memory_space<vmem>>) attributes {dimension_semantics = [#tpu.dimension_semantics<parallel>], iteration_bounds = array<i64: 1>, scalar_prefetch = 0 : i64, scratch_operands = 0 : i64, tpu.core_type = #tpu.core_type<tc>, window_params = [{transform_indices = @transform_0, window_bounds = array<i64: 8, 16>}, {pipeline_mode = #tpu.pipeline_mode<synchronous>, transform_indices = @transform_1, window_bounds = array<i64: 16, 128>}, {pipeline_mode = #tpu.pipeline_mode<synchronous>, transform_indices = @transform_2, window_bounds = array<i64: 1, 128>}, {pipeline_mode = #tpu.pipeline_mode<synchronous>, transform_indices = @transform_3, window_bounds = array<i64: 128, 128>}, {pipeline_mode = #tpu.pipeline_mode<synchronous>, transform_indices = @transform_4, window_bounds = array<i64: 1, 128>}, {pipeline_mode = #tpu.pipeline_mode<synchronous>, transform_indices = @transform_5, window_bounds = array<i64: 128, 128>}, {pipeline_mode = #tpu.pipeline_mode<synchronous>, transform_indices = @transform_6, window_bounds = array<i64: 1, 128>}, {pipeline_mode = #tpu.pipeline_mode<synchronous>, transform_indices = @transform_7, window_bounds = array<i64: 128, 128>}, {transform_indices = @transform_8, window_bounds = array<i64: 8, 128>}, {transform_indices = @transform_9, window_bounds = array<i64: 8, 128>}, {transform_indices = @transform_10, window_bounds = array<i64: 8, 128>}, {transform_indices = @transform_11, window_bounds = array<i64: 8, 128>}]} {
    %c0 = arith.constant 0 : index
    %c0_0 = arith.constant 0 : index
    %0 = vector.load %arg1[%c0, %c0_0] : memref<8x16xbf16, #tpu.memory_space<vmem>>, vector<8x16xbf16>
    %c0_1 = arith.constant 0 : index
    %c0_2 = arith.constant 0 : index
    %1 = vector.load %arg2[%c0_1, %c0_2] : memref<16x128xbf16, #tpu.memory_space<vmem>>, vector<16x128xbf16>
    %cst = arith.constant dense<0.000000e+00> : vector<8x128xf32>
    %2 = tpu.matmul %0, %1, %cst {dimension_numbers = #tpu.dot_dimension_numbers<[1], [0], [0], [1], [0, 0, 1, 1], [], []>} : vector<8x16xbf16>, vector<16x128xbf16>, vector<8x128xf32> -> vector<8x128xf32>
    %c0_3 = arith.constant 0 : index
    %c0_4 = arith.constant 0 : index
    %3 = vector.load %arg3[%c0_3, %c0_4] : memref<1x128xf32, #tpu.memory_space<vmem>>, vector<1x128xf32>
    %4 = vector.broadcast %3 : vector<1x128xf32> to vector<8x128xf32>
    %5 = arith.addf %2, %4 : vector<8x128xf32>
    %cst_5 = arith.constant 0.000000e+00 : f32
    %6 = vector.broadcast %cst_5 : f32 to vector<8x128xf32>
    %7 = arith.maximumf %5, %6 : vector<8x128xf32>
    %8 = arith.truncf %7 : vector<8x128xf32> to vector<8x128xbf16>
    %c0_6 = arith.constant 0 : index
    %c0_7 = arith.constant 0 : index
    %9 = vector.load %arg4[%c0_6, %c0_7] : memref<128x128xbf16, #tpu.memory_space<vmem>>, vector<128x128xbf16>
    %cst_8 = arith.constant dense<0.000000e+00> : vector<8x128xf32>
    %10 = tpu.matmul %8, %9, %cst_8 {dimension_numbers = #tpu.dot_dimension_numbers<[1], [0], [0], [1], [0, 0, 1, 1], [], []>} : vector<8x128xbf16>, vector<128x128xbf16>, vector<8x128xf32> -> vector<8x128xf32>
    %c0_9 = arith.constant 0 : index
    %c0_10 = arith.constant 0 : index
    %11 = vector.load %arg5[%c0_9, %c0_10] : memref<1x128xf32, #tpu.memory_space<vmem>>, vector<1x128xf32>
    %12 = vector.broadcast %11 : vector<1x128xf32> to vector<8x128xf32>
    %13 = arith.addf %10, %12 : vector<8x128xf32>
    %cst_11 = arith.constant 0.000000e+00 : f32
    %14 = vector.broadcast %cst_11 : f32 to vector<8x128xf32>
    %15 = arith.maximumf %13, %14 : vector<8x128xf32>
    %16 = arith.truncf %15 : vector<8x128xf32> to vector<8x128xbf16>
    %c0_12 = arith.constant 0 : index
    %c0_13 = arith.constant 0 : index
    %17 = vector.load %arg9[%c0_12, %c0_13] : memref<8x128xbf16, #tpu.memory_space<vmem>>, vector<8x128xbf16>
    tpu.vector_store %arg9[%c0_12, %c0_13], %16 {strides = array<i32>} : memref<8x128xbf16, #tpu.memory_space<vmem>>, vector<8x128xbf16>,
    %18 = arith.truncf %15 : vector<8x128xf32> to vector<8x128xbf16>
    %c0_14 = arith.constant 0 : index
    %c0_15 = arith.constant 0 : index
    %19 = vector.load %arg6[%c0_14, %c0_15] : memref<128x128xbf16, #tpu.memory_space<vmem>>, vector<128x128xbf16>
    %cst_16 = arith.constant dense<0.000000e+00> : vector<8x128xf32>
    %20 = tpu.matmul %18, %19, %cst_16 {dimension_numbers = #tpu.dot_dimension_numbers<[1], [0], [0], [1], [0, 0, 1, 1], [], []>} : vector<8x128xbf16>, vector<128x128xbf16>, vector<8x128xf32> -> vector<8x128xf32>
    %c0_17 = arith.constant 0 : index
    %c0_18 = arith.constant 0 : index
    %21 = vector.load %arg7[%c0_17, %c0_18] : memref<1x128xf32, #tpu.memory_space<vmem>>, vector<1x128xf32>
    %22 = vector.broadcast %21 : vector<1x128xf32> to vector<8x128xf32>
    %23 = arith.addf %20, %22 : vector<8x128xf32>
    %24 = arith.truncf %23 : vector<8x128xf32> to vector<8x128xbf16>
    %c0_19 = arith.constant 0 : index
    %c0_20 = arith.constant 0 : index
    %25 = vector.load %arg10[%c0_19, %c0_20] : memref<8x128xbf16, #tpu.memory_space<vmem>>, vector<8x128xbf16>
    tpu.vector_store %arg10[%c0_19, %c0_20], %24 {strides = array<i32>} : memref<8x128xbf16, #tpu.memory_space<vmem>>, vector<8x128xbf16>,
    %cst_21 = arith.constant dense<0xFF800000> : vector<8xf32>
    %26 = vector.multi_reduction <maximumf>, %23, %cst_21 [1] : vector<8x128xf32> to vector<8xf32>
    %27 = vector.shape_cast %26 : vector<8xf32> to vector<8x1xf32>
    %28 = vector.broadcast %27 : vector<8x1xf32> to vector<8x128xf32>
    %29 = arith.subf %23, %28 : vector<8x128xf32>
    %30 = math.exp %29 : vector<8x128xf32>
    %cst_22 = arith.constant dense<0.000000e+00> : vector<8xf32>
    %31 = vector.multi_reduction <add>, %30, %cst_22 [1] : vector<8x128xf32> to vector<8xf32>
    %32 = vector.shape_cast %31 : vector<8xf32> to vector<8x1xf32>
    %33 = tpu.reciprocal %32 : vector<8x1xf32> -> vector<8x1xf32>
    %34 = vector.broadcast %33 : vector<8x1xf32> to vector<8x128xf32>
    %35 = arith.mulf %30, %34 : vector<8x128xf32>
    %c0_23 = arith.constant 0 : index
    %c0_24 = arith.constant 0 : index
    %36 = vector.load %arg11[%c0_23, %c0_24] : memref<8x128xf32, #tpu.memory_space<vmem>>, vector<8x128xf32>
    tpu.vector_store %arg11[%c0_23, %c0_24], %35 {strides = array<i32>} : memref<8x128xf32, #tpu.memory_space<vmem>>, vector<8x128xf32>,
    %37 = arith.truncf %35 : vector<8x128xf32> to vector<8x128xbf16>
    %c0_25 = arith.constant 0 : index
    %c0_26 = arith.constant 0 : index
    %38 = vector.load %arg8[%c0_25, %c0_26] : memref<128x128xbf16, #tpu.memory_space<vmem>>, vector<128x128xbf16>
    %cst_27 = arith.constant dense<0.000000e+00> : vector<8x128xf32>
    %39 = tpu.matmul %37, %38, %cst_27 {dimension_numbers = #tpu.dot_dimension_numbers<[1], [0], [0], [1], [0, 0, 1, 1], [], []>} : vector<8x128xbf16>, vector<128x128xbf16>, vector<8x128xf32> -> vector<8x128xf32>
    %cst_28 = arith.constant 0.000000e+00 : f32
    %cst_29 = arith.constant 1.000000e+00 : f32
    %40 = vector.broadcast %cst_28 : f32 to vector<8x128xf32>
    %41 = arith.maximumf %40, %39 : vector<8x128xf32>
    %42 = vector.broadcast %cst_29 : f32 to vector<8x128xf32>
    %43 = arith.minimumf %42, %41 : vector<8x128xf32>
    %c0_30 = arith.constant 0 : index
    %c0_31 = arith.constant 0 : index
    %44 = vector.load %arg12[%c0_30, %c0_31] : memref<8x128xf32, #tpu.memory_space<vmem>>, vector<8x128xf32>
    tpu.vector_store %arg12[%c0_30, %c0_31], %43 {strides = array<i32>} : memref<8x128xf32, #tpu.memory_space<vmem>>, vector<8x128xf32>,
    return
  }
  func.func @transform_0(%arg0: i32) -> (i32, i32) {
    %c0_i32 = arith.constant 0 : i32
    %c0_i32_0 = arith.constant 0 : i32
    return %arg0, %c0_i32 : i32, i32
  }
  func.func @transform_1(%arg0: i32) -> (i32, i32) {
    %c0_i32 = arith.constant 0 : i32
    %c0_i32_0 = arith.constant 0 : i32
    %c0_i32_1 = arith.constant 0 : i32
    return %c0_i32, %c0_i32_0 : i32, i32
  }
  func.func @transform_2(%arg0: i32) -> (i32, i32) {
    %c0_i32 = arith.constant 0 : i32
    %c0_i32_0 = arith.constant 0 : i32
    %c0_i32_1 = arith.constant 0 : i32
    return %c0_i32, %c0_i32_0 : i32, i32
  }
  func.func @transform_3(%arg0: i32) -> (i32, i32) {
    %c0_i32 = arith.constant 0 : i32
    %c0_i32_0 = arith.constant 0 : i32
    %c0_i32_1 = arith.constant 0 : i32
    return %c0_i32, %c0_i32_0 : i32, i32
  }
  func.func @transform_4(%arg0: i32) -> (i32, i32) {
    %c0_i32 = arith.constant 0 : i32
    %c0_i32_0 = arith.constant 0 : i32
    %c0_i32_1 = arith.constant 0 : i32
    return %c0_i32, %c0_i32_0 : i32, i32
  }
  func.func @transform_5(%arg0: i32) -> (i32, i32) {
    %c0_i32 = arith.constant 0 : i32
    %c0_i32_0 = arith.constant 0 : i32
    %c0_i32_1 = arith.constant 0 : i32
    return %c0_i32, %c0_i32_0 : i32, i32
  }
  func.func @transform_6(%arg0: i32) -> (i32, i32) {
    %c0_i32 = arith.constant 0 : i32
    %c0_i32_0 = arith.constant 0 : i32
    %c0_i32_1 = arith.constant 0 : i32
    return %c0_i32, %c0_i32_0 : i32, i32
  }
  func.func @transform_7(%arg0: i32) -> (i32, i32) {
    %c0_i32 = arith.constant 0 : i32
    %c0_i32_0 = arith.constant 0 : i32
    %c0_i32_1 = arith.constant 0 : i32
    return %c0_i32, %c0_i32_0 : i32, i32
  }
  func.func @transform_8(%arg0: i32) -> (i32, i32) {
    %c0_i32 = arith.constant 0 : i32
    %c0_i32_0 = arith.constant 0 : i32
    return %arg0, %c0_i32 : i32, i32
  }
  func.func @transform_9(%arg0: i32) -> (i32, i32) {
    %c0_i32 = arith.constant 0 : i32
    %c0_i32_0 = arith.constant 0 : i32
    return %arg0, %c0_i32 : i32, i32
  }
  func.func @transform_10(%arg0: i32) -> (i32, i32) {
    %c0_i32 = arith.constant 0 : i32
    %c0_i32_0 = arith.constant 0 : i32
    return %arg0, %c0_i32 : i32, i32
  }
  func.func @transform_11(%arg0: i32) -> (i32, i32) {
    %c0_i32 = arith.constant 0 : i32
    %c0_i32_0 = arith.constant 0 : i32
    return %arg0, %c0_i32 : i32, i32
  }
}

</mosaic_0001>

<bundles_post_ra>
// kernel: tpu_custom_call.1
= control target key start
LH: loop header
LB: loop body
LE: loop exit
PB: predicated region body
PF: predicated region fallthrough
CT: control target
= control target key end

     0   :  { %17 = vsyncpa [#allocation3], 0  ;;  %s1080_s0 = inlined_call_operand.hbm [shape: bf16[8,16], index: 0, kind: input, shape index: {}]   ;;  %s1081_s1 = inlined_call_operand.hbm [shape: bf16[16,128], index: 1, kind: input, shape index: {}]   ;;  %s1082_s2 = inlined_call_operand.vmem [shape: f32[1,128], index: 2, kind: input, shape index: {}]   ;;  %s1083_s3 = inlined_call_operand.hbm [shape: bf16[128,128], index: 3, kind: input, shape index: {}]   ;;  %s1084_s4 = inlined_call_operand.vmem [shape: f32[1,128], index: 4, kind: input, shape index: {}]   ;;  %s1085_s5 = inlined_call_operand.hbm [shape: bf16[128,128], index: 5, kind: input, shape index: {}]   ;;  %s1086_s6 = inlined_call_operand.vmem [shape: f32[1,128], index: 6, kind: input, shape index: {}]   ;;  %s1087_s7 = inlined_call_operand.hbm [shape: bf16[128,128], index: 7, kind: input, shape index: {}]   ;;  %s1088_s8 = inlined_call_operand.hbm [shape: bf16[8,128], index: 8, kind: output, shape index: {0}]   ;;  %s1089_s9 = inlined_call_operand.hbm [shape: bf16[8,128], index: 9, kind: output, shape index: {1}]   ;;  %s1090_s10 = inlined_call_operand.hbm [shape: f32[8,128], index: 10, kind: output, shape index: {2}]   ;;  %s1091_s11 = inlined_call_operand.hbm [shape: f32[8,128], index: 11, kind: output, shape index: {3}]  }
   0x1   :  { %18 = vsyncpa [#allocation6], 0 }
   0x2   :  { %19 = vsyncpa [#allocation9], 0 }
   0x3   :  { %20 = vsyncpa [#allocation4], 0 }
   0x4   :  { %21 = vsyncpa [#allocation13], 0 }
   0x5   :  { %22 = vsyncpa [#allocation16], 0  ;;  %s926_s17 = smov [#allocation5]  }
   0x6   :  { %s38_s18 = sshll.u32 %s926_s17, 4  ;;  %s39_s18 = int_to_ptr.vmem [resolvable:$true] %s38_s18 }
   0x7   :  { %s742_s19 = scalar_lea.vmem %s39_s18, 128  ;;  %p747_p1 = scmp.lt.s32.totalorder %s39_s18, %s39_s18 }
   0x8   :  { %p743_p0 = scmp.ne.s32.totalorder %s39_s18, %s742_s19  ;;  %p748_p2 = scmp.lt.s32.totalorder %s742_s19, %s742_s19 }
   0xa   :  { %p749_p3 = por %p748_p2, %p747_p1 }
   0xc   :  { %p750_p4 = pnand %p749_p3, %p743_p0 }
   0xe   :  { %753 = shalt.err (!%p750_p4)
}
   0xf   :  { %s927_s20 = smov 64   ;;  %s928_s21 = smov 4  }
  0x10   :  { %44 = dma.hbm_to_vmem [thread:$0]  %s1081_s1, 128, %s39_s18, [#allocation6], %s927_s20, %s927_s20, %s928_s21  }
  0x11   :  { %s929_s24 = smov [#allocation8]   ;;  %s930_s26 = smov [#allocation2]  }
  0x12   :  { %s66_s25 = sshll.u32 %s929_s24, 4  ;;  %s29_s27 = sshll.u32 %s930_s26, 4  ;;  %s67_s25 = int_to_ptr.vmem [resolvable:$true] %s66_s25  ;;  %s30_s27 = int_to_ptr.vmem [resolvable:$true] %s29_s27 }
  0x13   :  { %s762_s28 = scalar_lea.vmem %s67_s25, 1024  ;;  %p767_p6 = scmp.lt.s32.totalorder %s67_s25, %s67_s25 }
  0x14   :  { %p763_p5 = scmp.ne.s32.totalorder %s67_s25, %s762_s28  ;;  %p768_p7 = scmp.lt.s32.totalorder %s762_s28, %s762_s28 }
  0x16   :  { %p769_p8 = por %p768_p7, %p767_p6 }
  0x18   :  { %p770_p9 = pnand %p769_p8, %p763_p5 }
  0x1a   :  { %773 = shalt.err (!%p770_p9)
}
  0x1b   :  { %72 = dma.hbm_to_vmem [thread:$0]  %s1085_s5, 1024, %s67_s25, [#allocation9], %s927_s20, %s927_s20, %s928_s21  }
  0x1c   :  { %s782_s1 = scalar_lea.vmem %s30_s27, 64  ;;  %p787_p11 = scmp.lt.s32.totalorder %s30_s27, %s30_s27 }
  0x1d   :  { %p783_p10 = scmp.ne.s32.totalorder %s30_s27, %s782_s1  ;;  %p788_p12 = scmp.lt.s32.totalorder %s782_s1, %s782_s1 }
  0x1f   :  { %p789_p13 = por %p788_p12, %p787_p11 }
  0x21   :  { %p790_p0 = pnand %p789_p13, %p783_p10 }
  0x23   :  { %793 = shalt.err (!%p790_p0)
}
  0x24   :  { %32 = dma.hbm_to_vmem [thread:$0]  %s1080_s0, 64, %s30_s27, [#allocation3]  }
  0x25   :  { %s931_s14 = smov [#allocation7]   ;;  %s932_s16 = smov [#allocation10]  }
  0x26   :  { %s52_s15 = sshll.u32 %s931_s14, 4  ;;  %s80_s17 = sshll.u32 %s932_s16, 4  ;;  %s53_s15 = int_to_ptr.vmem [resolvable:$true] %s52_s15  ;;  %s81_s17 = int_to_ptr.vmem [resolvable:$true] %s80_s17 }
  0x27   :  { %s802_s18 = scalar_lea.vmem %s53_s15, 1024  ;;  %p807_p2 = scmp.lt.s32.totalorder %s53_s15, %s53_s15 }
  0x28   :  { %p803_p1 = scmp.ne.s32.totalorder %s53_s15, %s802_s18  ;;  %p808_p3 = scmp.lt.s32.totalorder %s802_s18, %s802_s18 }
  0x2a   :  { %p809_p4 = por %p808_p3, %p807_p2 }
  0x2c   :  { %p810_p5 = pnand %p809_p4, %p803_p1 }
  0x2e   :  { %813 = shalt.err (!%p810_p5)
}
  0x2f   :  { %58 = dma.hbm_to_vmem [thread:$0]  %s1083_s3, 1024, %s53_s15, [#allocation6], %s927_s20, %s927_s20, %s928_s21  }
  0x30   :  { %s822_s0 = scalar_lea.vmem %s81_s17, 1024  ;;  %p827_p7 = scmp.lt.s32.totalorder %s81_s17, %s81_s17 }
  0x31   :  { %p823_p6 = scmp.ne.s32.totalorder %s81_s17, %s822_s0  ;;  %p828_p8 = scmp.lt.s32.totalorder %s822_s0, %s822_s0 }
  0x33   :  { %p829_p9 = por %p828_p8, %p827_p7 }
  0x35   :  { %p830_p10 = pnand %p829_p9, %p823_p6 }
  0x37   :  { %833 = shalt.err (!%p830_p10)
}
  0x38   :  { %86 = dma.hbm_to_vmem [thread:$0]  %s1087_s7, 1024, %s81_s17, [#allocation9], %s927_s20, %s927_s20, %s928_s21  }
  0x39   :  { %914 = dma.done.wait [#allocation3], 64  }
  0x3a   :  { %915 = vsyncadd [#allocation3], 4294967232 }
  0x3b   :  { %916 = dma.done.wait [#allocation6], 1152  }
  0x3c   :  { %917 = vsyncadd [#allocation6], 4294966144 }
  0x3d   :  { %918 = dma.done.wait [#allocation9], 2048  }
  0x3e   :  { %919 = vsyncadd [#allocation9], 4294965248  ;;  %v933_v0 = vmov 0.0   ;;  %vm934_vm0 = vmmov 0   ;;  %v705_v1 = vld [vmem:[#allocation5] sm:$0xff]   ;;  %vm119_vm1 = vcmask 130048  }
  0x3f   :  { %626 = vmatprep.subr.bf16.mxu0 %v933_v0  ;;  %628 = vmatprep.mubr.msk.bf16.mxu0 %vm934_vm0, %v933_v0  ;;  %v103_v2 = vld [vmem:[#allocation2] sm:$0xf]  ;;  %v706_v3 = vld [vmem:[#allocation7 + $0x38] sm:$0xff]   ;;  %v708_v5 = vld [vmem:[#allocation7 + $0x28] sm:$0xff]   ;;  %s936_s25 = smov [#allocation11]  }
  0x40   :  { %632 = vmatprep.subr.bf16.mxu1 %v933_v0  ;;  %648 = vmatprep.mubr.msk.bf16.mxu1 %vm934_vm0, %v933_v0  ;;  %v707_v4 = vld [vmem:[#allocation7 + $0x30] sm:$0xff]   ;;  %v709_v6 = vld [vmem:[#allocation7 + $0x20] sm:$0xff]   ;;  %v710_v7 = vld [vmem:[#allocation7 + $0x18] sm:$0xff]   ;;  %s516_s26 = sshll.u32 %s936_s25, 4  ;;  %s517_s26 = int_to_ptr.vmem [resolvable:$true] %s516_s26 }
  0x41   :  { %627 = vmatpush3.bf16.msra.mxu0 %v705_v1  ;;  %633 = vmatpush3.bf16.msra.mxu1 %v706_v3  ;;  %v711_v8 = vld [vmem:[#allocation7 + $0x10] sm:$0xff]   ;;  %v712_v9 = vld [vmem:[#allocation7 + $0x8] sm:$0xff]   ;;  %v713_v10 = vld [vmem:[#allocation7] sm:$0xff]  }
  0x42   :  { %652 = vmatprep.subr.bf16.mxu0 %v933_v0  ;;  %634 = vmatprep.subr.bf16.mxu1 %v933_v0  ;;  %v714_v11 = vld [vmem:[#allocation8 + $0x38] sm:$0xff]   ;;  %v715_v12 = vld [vmem:[#allocation8 + $0x30] sm:$0xff]   ;;  %v716_v13 = vld [vmem:[#allocation8 + $0x28] sm:$0xff]  }
  0x43   :  { %v717_v14 = vld [vmem:[#allocation8 + $0x20] sm:$0xff]   ;;  %v718_v15 = vld [vmem:[#allocation8 + $0x18] sm:$0xff]   ;;  %v719_v16 = vld [vmem:[#allocation8 + $0x10] sm:$0xff]  }
  0x44   :  { %629 = vmatmul.mubr.msk.bf16.vlgmr.msra.gmra.mxu0 %vm119_vm1, %v103_v2  ;;  %v568_v17 = vld [vmem:[%s1082_s2] ss:$0 sm:$0xff]  ;;  %v720_v25 = vld [vmem:[#allocation8 + $0x8] sm:$0xff]   ;;  %v721_v26 = vld [vmem:[#allocation8] sm:$0xff]  }
  0x45   :  { %668 = vmatprep.mubr.msk.bf16.mxu0 %vm934_vm0, %v933_v0  ;;  %635 = vmatpush3.bf16.msra.mxu1 %v707_v4  ;;  %v571_v27 = vld [vmem:[%s1084_s4] ss:$0 sm:$0xff]  ;;  %v722_v42 = vld [vmem:[#allocation10 + $0x38] sm:$0xff]   ;;  %v724_v44 = vld [vmem:[#allocation10 + $0x28] sm:$0xff]   ;;  %s935_s4 = smov [#allocation12]  }
  0x46   :  { %636 = vmatprep.subr.bf16.mxu1 %v933_v0  ;;  %653 = vmatpush3.bf16.msra.mxu0 %v714_v11  ;;  %v580_v35 = vld [vmem:[%s1086_s6] ss:$0 sm:$0xff]  ;;  %v725_v45 = vld [vmem:[#allocation10 + $0x20] sm:$0xff]   ;;  %v726_v50 = vld [vmem:[#allocation10 + $0x18] sm:$0xff]   ;;  %s526_s6 = sshll.u32 %s935_s4, 4  ;;  %s527_s6 = int_to_ptr.vmem [resolvable:$true] %s526_s6 }
  0x47   :  { %654 = vmatprep.subr.bf16.mxu0 %v933_v0  ;;  %v723_v43 = vld [vmem:[#allocation10 + $0x30] sm:$0xff]   ;;  %v728_v52 = vld [vmem:[#allocation10 + $0x8] sm:$0xff]   ;;  %v729_v53 = vld [vmem:[#allocation10] sm:$0xff]   ;;  %s834_s27 = scalar_lea.vmem %s527_s6, 64  ;;  %p839_p12 = scmp.lt.s32.totalorder %s527_s6, %s527_s6 }
  0x48   :  { %v727_v51 = vld [vmem:[#allocation10 + $0x10] sm:$0xff]   ;;  %p835_p11 = scmp.ne.s32.totalorder %s527_s6, %s834_s27  ;;  %p840_p13 = scmp.lt.s32.totalorder %s834_s27, %s834_s27 }
  0x49   :  { %637 = vmatpush3.bf16.msra.mxu1 %v708_v5 }
  0x4a   :  { %638 = vmatprep.subr.bf16.mxu1 %v933_v0  ;;  %655 = vmatpush3.bf16.msra.mxu0 %v715_v12  ;;  %p841_p0 = por %p840_p13, %p839_p12 }
  0x4b   :  { %656 = vmatprep.subr.bf16.mxu0 %v933_v0 }
  0x4c   :  { %p842_p1 = pnand %p841_p0, %p835_p11 }
  0x4d   :  { %639 = vmatpush3.bf16.msra.mxu1 %v709_v6 }
  0x4e   :  { %640 = vmatprep.subr.bf16.mxu1 %v933_v0  ;;  %657 = vmatpush3.bf16.msra.mxu0 %v716_v13 }
  0x4f   :  { %658 = vmatprep.subr.bf16.mxu0 %v933_v0 }
  0x51   :  { %641 = vmatpush3.bf16.msra.mxu1 %v710_v7 }
  0x52   :  { %642 = vmatprep.subr.bf16.mxu1 %v933_v0  ;;  %659 = vmatpush3.bf16.msra.mxu0 %v717_v14 }
  0x53   :  { %660 = vmatprep.subr.bf16.mxu0 %v933_v0 }
  0x55   :  { %643 = vmatpush3.bf16.msra.mxu1 %v711_v8 }
  0x56   :  { %644 = vmatprep.subr.bf16.mxu1 %v933_v0  ;;  %661 = vmatpush3.bf16.msra.mxu0 %v718_v15 }
  0x57   :  { %662 = vmatprep.subr.bf16.mxu0 %v933_v0 }
  0x59   :  { %645 = vmatpush3.bf16.msra.mxu1 %v712_v9 }
  0x5a   :  { %646 = vmatprep.subr.bf16.mxu1 %v933_v0  ;;  %663 = vmatpush3.bf16.msra.mxu0 %v719_v16 }
  0x5b   :  { %664 = vmatprep.subr.bf16.mxu0 %v933_v0 }
  0x5d   :  { %647 = vmatpush3.bf16.msra.mxu1 %v713_v10 }
  0x5e   :  { %672 = vmatprep.subr.bf16.mxu1 %v933_v0  ;;  %665 = vmatpush3.bf16.msra.mxu0 %v720_v25 }
  0x5f   :  { %666 = vmatprep.subr.bf16.mxu0 %v933_v0 }
  0x62   :  { %667 = vmatpush3.bf16.msra.mxu0 %v721_v26 }
 0x104   :  { %v157_v18 = vpop.f32.mrf.mxu0 }
 0x105   :  { %v158_v19 = vadd.f32 %v568_v17, %v157_v18 }
 0x106   :  { %v630_v20 = vpop.f32.mrf.mxu0 }
 0x107   :  { %v163_v21 = vmax.f32 %v158_v19, 0.0 }
 0x108   :  { %v160_v22 = vpop.f32.mrf.mxu0 }
 0x109   :  { %v164_v23 = vpack.c.bf16 %v163_v21, %v163_v21 }
 0x10a   :  { %v631_v24 = vpop.f32.mrf.mxu0 }
 0x10b   :  { %649 = vmatmul.mubr.bf16.vlgmr.msra.gmra.mxu1 %v164_v23 }
 0x10c   :  { %688 = vmatprep.mubr.msk.bf16.mxu1 %vm934_vm0, %v933_v0  ;;  %673 = vmatpush3.bf16.msra.mxu1 %v722_v42 }
 0x10d   :  { %674 = vmatprep.subr.bf16.mxu1 %v933_v0 }
 0x110   :  { %675 = vmatpush3.bf16.msra.mxu1 %v723_v43 }
 0x111   :  { %676 = vmatprep.subr.bf16.mxu1 %v933_v0 }
 0x114   :  { %677 = vmatpush3.bf16.msra.mxu1 %v724_v44 }
 0x115   :  { %678 = vmatprep.subr.bf16.mxu1 %v933_v0 }
 0x118   :  { %679 = vmatpush3.bf16.msra.mxu1 %v725_v45 }
 0x119   :  { %680 = vmatprep.subr.bf16.mxu1 %v933_v0 }
 0x11c   :  { %681 = vmatpush3.bf16.msra.mxu1 %v726_v50 }
 0x11d   :  { %682 = vmatprep.subr.bf16.mxu1 %v933_v0 }
 0x120   :  { %683 = vmatpush3.bf16.msra.mxu1 %v727_v51 }
 0x121   :  { %684 = vmatprep.subr.bf16.mxu1 %v933_v0 }
 0x124   :  { %685 = vmatpush3.bf16.msra.mxu1 %v728_v52 }
 0x125   :  { %686 = vmatprep.subr.bf16.mxu1 %v933_v0 }
 0x128   :  { %687 = vmatpush3.bf16.msra.mxu1 %v729_v53 }
 0x1cb   :  { %v270_v28 = vpop.f32.mrf.mxu1 }
 0x1cc   :  { %v271_v29 = vadd.f32 %v571_v27, %v270_v28 }
 0x1cd   :  { %v650_v30 = vpop.f32.mrf.mxu1 }
 0x1ce   :  { %v276_v31 = vmax.f32 %v271_v29, 0.0 }
 0x1cf   :  { %v273_v32 = vpop.f32.mrf.mxu1 }
 0x1d0   :  { %v277_v33 = vpack.c.bf16 %v276_v31, %v276_v31 }
 0x1d1   :  { %v651_v34 = vpop.f32.mrf.mxu1 }
 0x1d2   :  { %278 = vst [vmem:[#allocation11] sm:$0xf] %v277_v33  ;;  %669 = vmatmul.mubr.bf16.vlgmr.msra.gmra.mxu0 %v277_v33 }
 0x292   :  { %v384_v36 = vpop.f32.mrf.mxu0 }
 0x293   :  { %v385_v37 = vadd.f32 %v580_v35, %v384_v36 }
 0x294   :  { %v670_v38 = vpop.f32.mrf.mxu0 }
 0x295   :  { %392 = vmax.xlane.f32.xlu0 %v385_v37  ;;  %v390_v39 = vpack.c.bf16 %v385_v37, %v385_v37 }
 0x296   :  { %v387_v40 = vpop.f32.mrf.mxu0 }
 0x297   :  { %391 = vst [vmem:[#allocation12] sm:$0xf] %v390_v39 }
 0x298   :  { %v671_v41 = vpop.f32.mrf.mxu0 }
 0x31e   :  { %v393_v46 = vpop.xlane.xlu0 %392 }
 0x31f   :  { %v394_v47 = vsub.f32 %v385_v37, %v393_v46 }
 0x321   :  { %v395_v48 = vmul.f32 1.442695, %v394_v47 }
 0x323   :  { %730 = vpow2.f32 %v395_v48 }
 0x330   :  { %v731_v49 = vpop.eup %730 }
 0x331   :  { %397 = vadd.xlane.f32.xlu0 %v731_v49 }
 0x3ba   :  { %v398_v54 = vpop.xlane.xlu0 %397 }
 0x3bb   :  { %732 = vrcp.f32 %v398_v54 }
 0x3c8   :  { %v733_v55 = vpop.eup %732 }
 0x3c9   :  { %v400_v56 = vmul.f32 %v733_v55, %v731_v49 }
 0x3cb   :  { %v402_v57 = vpack.c.bf16 %v400_v56, %v400_v56  ;;  %401 = vst [vmem:[#allocation14] sm:$0xff] %v400_v56 }
 0x3cd   :  { %689 = vmatmul.mubr.bf16.vlgmr.msra.gmra.mxu1 %v402_v57 }
 0x3ce   :  { %845 = shalt.err (!%p842_p1)
}
 0x3cf   :  { %529 = dma.vmem_to_hbm [thread:$0]  %s527_s6, 64, %s1089_s9, [#allocation13]  }
 0x3d0   :  { %s854_s30 = scalar_lea.vmem %s517_s26, 64  ;;  %p859_p3 = scmp.lt.s32.totalorder %s517_s26, %s517_s26 }
 0x3d1   :  { %p855_p2 = scmp.ne.s32.totalorder %s517_s26, %s854_s30  ;;  %p860_p4 = scmp.lt.s32.totalorder %s854_s30, %s854_s30 }
 0x3d3   :  { %p861_p5 = por %p860_p4, %p859_p3 }
 0x3d5   :  { %p862_p6 = pnand %p861_p5, %p855_p2 }
 0x3d7   :  { %865 = shalt.err (!%p862_p6)
}
 0x3d8   :  { %519 = dma.vmem_to_hbm [thread:$0]  %s517_s26, 64, %s1088_s8, [#allocation4]  }
 0x3d9   :  { %s937_s13 = smov [#allocation14]  }
 0x3da   :  { %s536_s14 = sshll.u32 %s937_s13, 4  ;;  %s537_s14 = int_to_ptr.vmem [resolvable:$true] %s536_s14 }
 0x3db   :  { %s874_s15 = scalar_lea.vmem %s537_s14, 128  ;;  %p879_p8 = scmp.lt.s32.totalorder %s537_s14, %s537_s14 }
 0x3dc   :  { %p875_p7 = scmp.ne.s32.totalorder %s537_s14, %s874_s15  ;;  %p880_p9 = scmp.lt.s32.totalorder %s874_s15, %s874_s15 }
 0x3de   :  { %p881_p10 = por %p880_p9, %p879_p8 }
 0x3e0   :  { %p882_p11 = pnand %p881_p10, %p875_p7 }
 0x3e2   :  { %885 = shalt.err (!%p882_p11)
}
 0x3e3   :  { %539 = dma.vmem_to_hbm [thread:$0]  %s537_s14, 128, %s1090_s10, [#allocation13]  }
 0x3e4   :  { %s938_s17 = smov [#allocation15]  }
 0x3e5   :  { %s546_s18 = sshll.u32 %s938_s17, 4  ;;  %s547_s18 = int_to_ptr.vmem [resolvable:$true] %s546_s18 }
 0x3e6   :  { %s894_s8 = scalar_lea.vmem %s547_s18, 128  ;;  %p899_p13 = scmp.lt.s32.totalorder %s547_s18, %s547_s18 }
 0x3e7   :  { %p895_p12 = scmp.ne.s32.totalorder %s547_s18, %s894_s8  ;;  %p900_p0 = scmp.lt.s32.totalorder %s894_s8, %s894_s8 }
 0x3e9   :  { %p901_p1 = por %p900_p0, %p899_p13 }
 0x3eb   :  { %p902_p2 = pnand %p901_p1, %p895_p12 }
 0x48d   :  { %v501_v58 = vpop.f32.mrf.mxu1 }
 0x48e   :  { %v507_v59 = vmax.f32 %v501_v58, 0.0 }
 0x48f   :  { %v690_v60 = vpop.f32.mrf.mxu1 }
 0x490   :  { %v508_v61 = vmin.f32 %v507_v59, 1.0 }
 0x491   :  { %v504_v62 = vpop.f32.mrf.mxu1 }
 0x492   :  { %509 = vst [vmem:[#allocation15] sm:$0xff] %v508_v61 }
 0x493   :  { %v691_v63 = vpop.f32.mrf.mxu1 }
 0x494   :  { %905 = shalt.err (!%p902_p2)
}
 0x495   :  { %549 = dma.vmem_to_hbm [thread:$0]  %s547_s18, 128, %s1091_s11, [#allocation16]  }
 0x496   :  { %920 = dma.done.wait [#allocation4], 64  }
 0x497   :  { %921 = vsyncadd [#allocation4], 4294967232 }
 0x498   :  { %922 = dma.done.wait [#allocation13], 192  }
 0x499   :  { %923 = vsyncadd [#allocation13], 4294967104 }
 0x49a   :  { %924 = dma.done.wait [#allocation16], 128  }
 0x49b   :  { %925 = vsyncadd [#allocation16], 4294967168 }
 0x49c   :  { %562 = vsyncpa [#allocation3], 1 }
 0x49d   :  { %563 = vsyncpa [#allocation6], 1 }
 0x49e   :  { %564 = vsyncpa [#allocation9], 1 }
 0x49f   :  { %565 = vsyncpa [#allocation4], 1 }
 0x4a0   :  { %566 = vsyncpa [#allocation13], 1 }
 0x4a1   :  { %567 = vsyncpa [#allocation16], 1 }

</bundles_post_ra>
